<compile_context>
chip_gen: v7x
topology: tpu7x:2x2x1
jax: 0.10.0
libtpu: 0.0.40
codegen_flags: <defaults>
</compile_context>

<pallas_src>
import jax
import jax.numpy as jnp
from jax.experimental import pallas as pl
from jax.experimental.pallas import tpu as pltpu

IN_DIM = 32 * 32 * 3   # 3072
H1 = 120
H2 = 84
OUT_DIM = 10
PAD = 128              # lane-padded hidden width (fc1/fc2 outputs)
OUT_PAD = 16           # lane-padded fc3 output width (10 -> 16)


def _chip_info():
    """Chip generation string + physical per-core VMEM bytes.

    Uses pltpu.get_tpu_info() where available (the device the computation is
    committed to), with a device_kind fallback, per the multi-host concern in
    the perf review.
    """
    kind = jax.devices()[0].device_kind.lower()
    vmem_cap = None
    try:
        vmem_cap = int(pltpu.get_tpu_info().vmem_capacity_bytes)
    except Exception:
        vmem_cap = None
    if not vmem_cap:
        vmem_cap = (64 << 20) if "v7" in kind else (128 << 20)
    return kind, vmem_cap


def _round_up16(n):
    return ((n + 15) // 16) * 16


def _choose_batch_tile(B, kind):
    """Batch tile giving >= 2-3 pipeline steps per TensorCore once B is large.

    Tiles are multiples of 16 rows (legal second-minor dim for both bf16 and
    f32 blocks); tiny batches use an exact full-array block.
    """
    if B <= 8:
        return B
    if "v7" in kind:
        # 2 TensorCores, 64 MiB VMEM each: target ~8 grid steps, 256..512 rows.
        tb = min(max(_round_up16(pl.cdiv(B, 8)), 256), 512)
    else:
        # single TensorCore (v5e/v6e): >= 3 grid steps for large B, 256..1024 rows.
        tb = min(max(_round_up16(pl.cdiv(B, 3)), 256), 1024)
    return min(tb, _round_up16(B))


def _vmem_limit_bytes(TB, x_itemsize, vmem_cap):
    """Scoped VMEM budget derived from the actual buffer sizes (+ slack)."""
    x_buf = 2 * TB * IN_DIM * x_itemsize                          # double-buffered x tile
    o_buf = 2 * TB * OUT_PAD * 4                                  # double-buffered output tile
    w_buf = 2 * (2 * (IN_DIM * PAD + PAD * PAD + PAD * OUT_PAD)   # bf16 weights (x2 buffers)
                 + 4 * (2 * PAD + OUT_PAD))                       # f32 biases
    acts = 2 * TB * PAD * 4 + TB * IN_DIM * 2                     # f32 h1/h2 + bf16 x copy
    need = int((x_buf + o_buf + w_buf + acts) * 1.25) + (8 << 20)  # compiler scratch / slack
    return min(max(need, 24 << 20), int(vmem_cap * 0.75))


def _mlp_kernel(x_ref, w1_ref, b1_ref, w2_ref, b2_ref, w3_ref, b3_ref, o_ref):
    # One (TB, 3072) batch tile per grid step; weights/biases are VMEM-resident.
    # bf16 operands feed the MXU; accumulation stays in f32. The astype is a
    # no-op when x is already bf16 (the preferred input contract).
    x = x_ref[...].astype(jnp.bfloat16)
    h1 = jnp.dot(x, w1_ref[...], preferred_element_type=jnp.float32) + b1_ref[...]
    h1 = jnp.maximum(h1, 0.0)
    h2 = jnp.dot(h1.astype(jnp.bfloat16), w2_ref[...],
                 preferred_element_type=jnp.float32) + b2_ref[...]
    h2 = jnp.maximum(h2, 0.0)
    h3 = jnp.dot(h2.astype(jnp.bfloat16), w3_ref[...],
                 preferred_element_type=jnp.float32) + b3_ref[...]
    o_ref[...] = jnp.maximum(h3, 0.0).astype(o_ref.dtype)


@jax.jit
def boring_net2_forward(x_nchw, params):
    """x_nchw: (B, 3, 32, 32), bf16 (preferred) or f32 -> (B, 10) float32."""
    w1, b1, w2, b2, w3, b3 = params
    B = x_nchw.shape[0]
    x = x_nchw.reshape(B, IN_DIM)  # same flattening order as torch .view(-1, 3072)

    kind, vmem_cap = _chip_info()
    TB = _choose_batch_tile(B, kind)
    grid = (pl.cdiv(B, TB),)

    # NOTE: single-buffering the constant weight blocks (pipeline_mode=
    # pl.Buffered(1)) would save ~0.9 MiB VMEM and deeper buffering on x may
    # hide step-boundary DMA gaps; both are "measure before keeping" items and
    # immaterial at these tile sizes, so they are intentionally left out.
    out = pl.pallas_call(
        _mlp_kernel,
        out_shape=jax.ShapeDtypeStruct((B, OUT_PAD), jnp.float32),
        grid=grid,
        in_specs=[
            pl.BlockSpec((TB, IN_DIM), lambda i: (i, 0)),     # streamed batch tile
            pl.BlockSpec((IN_DIM, PAD), lambda i: (0, 0)),    # VMEM-resident weights
            pl.BlockSpec((1, PAD), lambda i: (0, 0)),
            pl.BlockSpec((PAD, PAD), lambda i: (0, 0)),
            pl.BlockSpec((1, PAD), lambda i: (0, 0)),
            pl.BlockSpec((PAD, OUT_PAD), lambda i: (0, 0)),
            pl.BlockSpec((1, OUT_PAD), lambda i: (0, 0)),
        ],
        out_specs=pl.BlockSpec((TB, OUT_PAD), lambda i: (i, 0)),
        compiler_params=pltpu.CompilerParams(
            dimension_semantics=("parallel",),
            vmem_limit_bytes=_vmem_limit_bytes(TB, x.dtype.itemsize, vmem_cap),
        ),
    )(x, w1, b1, w2, b2, w3, b3)

    return out[:, :OUT_DIM]


def init_params(key):
    """nn.Linear-style init U(-1/sqrt(fan_in), 1/sqrt(fan_in)).

    Weights are stored (in, out) — transposed vs PyTorch — zero-padded once at
    init (fc1/fc2 to 128 lanes, fc3 to 16 output lanes) and cast to bf16 for
    the MXU. Biases stay f32. Zero padding propagates exactly through
    bias + ReLU, so the padded lanes remain zero.
    """
    ks = jax.random.split(key, 6)

    def lin(kw, kb, fan_in, fan_out):
        bound = 1.0 / jnp.sqrt(jnp.float32(fan_in))
        w = jax.random.uniform(kw, (fan_in, fan_out), jnp.float32, -bound, bound)
        b = jax.random.uniform(kb, (fan_out,), jnp.float32, -bound, bound)
        return w, b

    w1, b1 = lin(ks[0], ks[1], IN_DIM, H1)
    w2, b2 = lin(ks[2], ks[3], H1, H2)
    w3, b3 = lin(ks[4], ks[5], H2, OUT_DIM)

    def pad_w(w, rows, cols):
        r, c = w.shape
        return jnp.pad(w, ((0, rows - r), (0, cols - c))).astype(jnp.bfloat16)

    def pad_b(b, cols):
        return jnp.pad(b, (0, cols - b.shape[0])).reshape(1, cols).astype(jnp.float32)

    return (
        pad_w(w1, IN_DIM, PAD),  pad_b(b1, PAD),
        pad_w(w2, PAD, PAD),     pad_b(b2, PAD),
        pad_w(w3, PAD, OUT_PAD), pad_b(b3, OUT_PAD),
    )


def _reference_forward(x_nchw, params):
    """Plain-JAX reference with the same padded params / dtype flow."""
    w1, b1, w2, b2, w3, b3 = params
    x = x_nchw.reshape(x_nchw.shape[0], IN_DIM).astype(jnp.bfloat16)
    h = jnp.maximum(jnp.dot(x, w1, preferred_element_type=jnp.float32) + b1, 0.0)
    h = jnp.maximum(jnp.dot(h.astype(jnp.bfloat16), w2,
                            preferred_element_type=jnp.float32) + b2, 0.0)
    h = jnp.maximum(jnp.dot(h.astype(jnp.bfloat16), w3,
                            preferred_element_type=jnp.float32) + b3, 0.0)
    return h[:, :OUT_DIM]


if __name__ == "__main__":
    key = jax.random.PRNGKey(0)
    k_x, k_p = jax.random.split(key)

    # CIFAR-like input implied by fc1: (B, 3, 32, 32) NCHW, small batch.
    # Produced directly in bf16 ("bf16 at the producer" input contract, no
    # extra cast pass); f32 inputs also work (cast inside the kernel).
    x = jax.random.normal(k_x, (2, 3, 32, 32), dtype=jnp.bfloat16)
    params = init_params(k_p)

    out = boring_net2_forward(x, params)
    out = jax.block_until_ready(out)

    ref = _reference_forward(x, params)
    assert out.shape == (2, 10), out.shape
    assert jnp.allclose(out, ref, atol=1e-2, rtol=1e-2), "mismatch vs JAX reference"

    print("KERNEL_OK")
</pallas_src>

<mosaic_0001>
module attributes {stable_mosaic.version = 11 : i64} {
  func.func @_mlp_kernel(%arg0: i32, %arg1: memref<2x3072xbf16, #tpu.memory_space<vmem>>, %arg2: memref<3072x128xbf16, #tpu.memory_space<vmem>>, %arg3: memref<1x128xf32, #tpu.memory_space<vmem>>, %arg4: memref<128x128xbf16, #tpu.memory_space<vmem>>, %arg5: memref<1x128xf32, #tpu.memory_space<vmem>>, %arg6: memref<128x16xbf16, #tpu.memory_space<vmem>>, %arg7: memref<1x16xf32, #tpu.memory_space<vmem>>, %arg8: memref<2x16xf32, #tpu.memory_space<vmem>>) attributes {dimension_semantics = [#tpu.dimension_semantics<parallel>], iteration_bounds = array<i64: 1>, scalar_prefetch = 0 : i64, scratch_operands = 0 : i64, tpu.core_type = #tpu.core_type<tc>, window_params = [{transform_indices = @transform_0, window_bounds = array<i64: 2, 3072>}, {pipeline_mode = #tpu.pipeline_mode<synchronous>, transform_indices = @transform_1, window_bounds = array<i64: 3072, 128>}, {pipeline_mode = #tpu.pipeline_mode<synchronous>, transform_indices = @transform_2, window_bounds = array<i64: 1, 128>}, {pipeline_mode = #tpu.pipeline_mode<synchronous>, transform_indices = @transform_3, window_bounds = array<i64: 128, 128>}, {pipeline_mode = #tpu.pipeline_mode<synchronous>, transform_indices = @transform_4, window_bounds = array<i64: 1, 128>}, {pipeline_mode = #tpu.pipeline_mode<synchronous>, transform_indices = @transform_5, window_bounds = array<i64: 128, 16>}, {pipeline_mode = #tpu.pipeline_mode<synchronous>, transform_indices = @transform_6, window_bounds = array<i64: 1, 16>}, {transform_indices = @transform_7, window_bounds = array<i64: 2, 16>}]} {
    %c0 = arith.constant 0 : index
    %c0_0 = arith.constant 0 : index
    %0 = vector.load %arg1[%c0, %c0_0] : memref<2x3072xbf16, #tpu.memory_space<vmem>>, vector<2x3072xbf16>
    %c0_1 = arith.constant 0 : index
    %c0_2 = arith.constant 0 : index
    %1 = vector.load %arg2[%c0_1, %c0_2] : memref<3072x128xbf16, #tpu.memory_space<vmem>>, vector<3072x128xbf16>
    %cst = arith.constant dense<0.000000e+00> : vector<2x128xf32>
    %2 = tpu.matmul %0, %1, %cst {dimension_numbers = #tpu.dot_dimension_numbers<[1], [0], [0], [1], [0, 0, 1, 1], [], []>} : vector<2x3072xbf16>, vector<3072x128xbf16>, vector<2x128xf32> -> vector<2x128xf32>
    %c0_3 = arith.constant 0 : index
    %c0_4 = arith.constant 0 : index
    %3 = vector.load %arg3[%c0_3, %c0_4] : memref<1x128xf32, #tpu.memory_space<vmem>>, vector<1x128xf32>
    %4 = vector.broadcast %3 : vector<1x128xf32> to vector<2x128xf32>
    %5 = arith.addf %2, %4 : vector<2x128xf32>
    %cst_5 = arith.constant 0.000000e+00 : f32
    %6 = vector.broadcast %cst_5 : f32 to vector<2x128xf32>
    %7 = arith.maximumf %5, %6 : vector<2x128xf32>
    %8 = arith.truncf %7 : vector<2x128xf32> to vector<2x128xbf16>
    %c0_6 = arith.constant 0 : index
    %c0_7 = arith.constant 0 : index
    %9 = vector.load %arg4[%c0_6, %c0_7] : memref<128x128xbf16, #tpu.memory_space<vmem>>, vector<128x128xbf16>
    %cst_8 = arith.constant dense<0.000000e+00> : vector<2x128xf32>
    %10 = tpu.matmul %8, %9, %cst_8 {dimension_numbers = #tpu.dot_dimension_numbers<[1], [0], [0], [1], [0, 0, 1, 1], [], []>} : vector<2x128xbf16>, vector<128x128xbf16>, vector<2x128xf32> -> vector<2x128xf32>
    %c0_9 = arith.constant 0 : index
    %c0_10 = arith.constant 0 : index
    %11 = vector.load %arg5[%c0_9, %c0_10] : memref<1x128xf32, #tpu.memory_space<vmem>>, vector<1x128xf32>
    %12 = vector.broadcast %11 : vector<1x128xf32> to vector<2x128xf32>
    %13 = arith.addf %10, %12 : vector<2x128xf32>
    %cst_11 = arith.constant 0.000000e+00 : f32
    %14 = vector.broadcast %cst_11 : f32 to vector<2x128xf32>
    %15 = arith.maximumf %13, %14 : vector<2x128xf32>
    %16 = arith.truncf %15 : vector<2x128xf32> to vector<2x128xbf16>
    %c0_12 = arith.constant 0 : index
    %c0_13 = arith.constant 0 : index
    %17 = vector.load %arg6[%c0_12, %c0_13] : memref<128x16xbf16, #tpu.memory_space<vmem>>, vector<128x16xbf16>
    %cst_14 = arith.constant dense<0.000000e+00> : vector<2x16xf32>
    %18 = tpu.matmul %16, %17, %cst_14 {dimension_numbers = #tpu.dot_dimension_numbers<[1], [0], [0], [1], [0, 0, 1, 1], [], []>} : vector<2x128xbf16>, vector<128x16xbf16>, vector<2x16xf32> -> vector<2x16xf32>
    %c0_15 = arith.constant 0 : index
    %c0_16 = arith.constant 0 : index
    %19 = vector.load %arg7[%c0_15, %c0_16] : memref<1x16xf32, #tpu.memory_space<vmem>>, vector<1x16xf32>
    %20 = vector.broadcast %19 : vector<1x16xf32> to vector<2x16xf32>
    %21 = arith.addf %18, %20 : vector<2x16xf32>
    %cst_17 = arith.constant 0.000000e+00 : f32
    %22 = vector.broadcast %cst_17 : f32 to vector<2x16xf32>
    %23 = arith.maximumf %21, %22 : vector<2x16xf32>
    %c0_18 = arith.constant 0 : index
    %c0_19 = arith.constant 0 : index
    %24 = vector.load %arg8[%c0_18, %c0_19] : memref<2x16xf32, #tpu.memory_space<vmem>>, vector<2x16xf32>
    tpu.vector_store %arg8[%c0_18, %c0_19], %23 {strides = array<i32>} : memref<2x16xf32, #tpu.memory_space<vmem>>, vector<2x16xf32>,
    return
  }
  func.func @transform_0(%arg0: i32) -> (i32, i32) {
    %c0_i32 = arith.constant 0 : i32
    %c0_i32_0 = arith.constant 0 : i32
    return %arg0, %c0_i32 : i32, i32
  }
  func.func @transform_1(%arg0: i32) -> (i32, i32) {
    %c0_i32 = arith.constant 0 : i32
    %c0_i32_0 = arith.constant 0 : i32
    %c0_i32_1 = arith.constant 0 : i32
    return %c0_i32, %c0_i32_0 : i32, i32
  }
  func.func @transform_2(%arg0: i32) -> (i32, i32) {
    %c0_i32 = arith.constant 0 : i32
    %c0_i32_0 = arith.constant 0 : i32
    %c0_i32_1 = arith.constant 0 : i32
    return %c0_i32, %c0_i32_0 : i32, i32
  }
  func.func @transform_3(%arg0: i32) -> (i32, i32) {
    %c0_i32 = arith.constant 0 : i32
    %c0_i32_0 = arith.constant 0 : i32
    %c0_i32_1 = arith.constant 0 : i32
    return %c0_i32, %c0_i32_0 : i32, i32
  }
  func.func @transform_4(%arg0: i32) -> (i32, i32) {
    %c0_i32 = arith.constant 0 : i32
    %c0_i32_0 = arith.constant 0 : i32
    %c0_i32_1 = arith.constant 0 : i32
    return %c0_i32, %c0_i32_0 : i32, i32
  }
  func.func @transform_5(%arg0: i32) -> (i32, i32) {
    %c0_i32 = arith.constant 0 : i32
    %c0_i32_0 = arith.constant 0 : i32
    %c0_i32_1 = arith.constant 0 : i32
    return %c0_i32, %c0_i32_0 : i32, i32
  }
  func.func @transform_6(%arg0: i32) -> (i32, i32) {
    %c0_i32 = arith.constant 0 : i32
    %c0_i32_0 = arith.constant 0 : i32
    %c0_i32_1 = arith.constant 0 : i32
    return %c0_i32, %c0_i32_0 : i32, i32
  }
  func.func @transform_7(%arg0: i32) -> (i32, i32) {
    %c0_i32 = arith.constant 0 : i32
    %c0_i32_0 = arith.constant 0 : i32
    return %arg0, %c0_i32 : i32, i32
  }
}

</mosaic_0001>

<bundles_post_ra>
// kernel: boring_net2_forward.1
= control target key start
LH: loop header
LB: loop body
LE: loop exit
PB: predicated region body
PF: predicated region fallthrough
CT: control target
= control target key end

     0   :  { %12 = vsyncpa [#allocation3], 0  ;;  %s3475_s0 = inlined_call_operand.vmem [shape: bf16[2,3072], index: 0, kind: input, shape index: {}]   ;;  %s3476_s1 = inlined_call_operand.hbm [shape: bf16[3072,128], index: 1, kind: input, shape index: {}]   ;;  %s3477_s2 = inlined_call_operand.vmem [shape: f32[1,128], index: 2, kind: input, shape index: {}]   ;;  %s3478_s3 = inlined_call_operand.vmem [shape: bf16[128,128], index: 3, kind: input, shape index: {}]   ;;  %s3479_s4 = inlined_call_operand.vmem [shape: f32[1,128], index: 4, kind: input, shape index: {}]   ;;  %s3480_s5 = inlined_call_operand.vmem [shape: bf16[128,16], index: 5, kind: input, shape index: {}]   ;;  %s3481_s6 = inlined_call_operand.vmem [shape: f32[1,16], index: 6, kind: input, shape index: {}]   ;;  %s3482_s7 = inlined_call_operand.hbm [shape: f32[2,16], index: 7, kind: output, shape index: {}]  }
   0x1   :  { %13 = vsyncpa [#allocation4], 0  ;;  %s3285_s24 = smov [#allocation2]   ;;  %s3237_s28 = scalar_lea.hbm %s3476_s1, 24576 }
   0x2   :  { %s21_s25 = sshll.u32 %s3285_s24, 4  ;;  %p3238_p0 = scmp.ne.s32.totalorder %s3476_s1, %s3237_s28  ;;  %s22_s25 = int_to_ptr.vmem [resolvable:$true] %s21_s25 }
   0x3   :  { %p3241_p1 = scmp.lt.u32.totalorder %s3237_s28, %s3476_s1 }
   0x5   :  { %p3243_p2 = pnand %p3241_p1, %p3238_p0 }
   0x7   :  { %3246 = shalt.err (!%p3243_p2)
}
   0x8   :  { %s3247_s10 = scalar_lea.vmem %s22_s25, 24576  ;;  %p3252_p4 = scmp.lt.s32.totalorder %s22_s25, %s22_s25 }
   0x9   :  { %p3248_p3 = scmp.ne.s32.totalorder %s22_s25, %s3247_s10  ;;  %p3253_p5 = scmp.lt.s32.totalorder %s3247_s10, %s3247_s10 }
   0xb   :  { %p3254_p6 = por %p3253_p5, %p3252_p4 }
   0xd   :  { %p3255_p7 = pnand %p3254_p6, %p3248_p3 }
   0xf   :  { %3258 = shalt.err (!%p3255_p7)
}
  0x10   :  { %s3286_s11 = smov 64   ;;  %s3287_s12 = smov 4  }
  0x11   :  { %27 = dma.hbm_to_vmem [thread:$0]  %s3476_s1, 24576, %s22_s25, [#allocation3], %s3286_s11, %s3286_s11, %s3287_s12  }
  0x12   :  { %3281 = dma.done.wait [#allocation3], 24576  }
  0x13   :  { %3282 = vsyncadd [#allocation3], 4294942720  ;;  %v3026_v0 = vld [vmem:[#allocation2 + $0x40] sm:$0xff]   ;;  %v3030_v4 = vld [vmem:[#allocation2 + $0x48] sm:$0xff]   ;;  %v3288_v22 = vmov 1966171168   ;;  %v443_v24 = vlaneseq }
  0x14   :  { %v3027_v1 = vld [vmem:[#allocation2 + $0xc0] sm:$0xff]   ;;  %2697 = vmatprep.subr.bf16.mxu0 %v3026_v0  ;;  %v3031_v5 = vld [vmem:[#allocation2 + $0xc8] sm:$0xff]   ;;  %v3034_v8 = vld [vmem:[#allocation2 + $0x50] sm:$0xff]   ;;  %v441_v23 = vunpack.c.l.s4 %v3288_v22  ;;  %vm3290_vm0 = vmmov 0   ;;  %s3291_s29 = smov [#allocation5]   ;;  %vm2469_vm1 = vcmask 123904  }
  0x15   :  { %v3028_v2 = vld [vmem:[#allocation2] sm:$0xff]   ;;  %2719 = vmatprep.subr.bf16.mxu1 %v3027_v1  ;;  %v3032_v6 = vld [vmem:[#allocation2 + $0x8] sm:$0xff]   ;;  %v3035_v9 = vld [vmem:[#allocation2 + $0xd0] sm:$0xff]   ;;  %v444_v30 = vshrl.u32 %v443_v24, 7 }
  0x16   :  { %v3029_v3 = vld [vmem:[#allocation2 + $0x80] sm:$0xff]   ;;  %2698 = vmatpush3.bf16.msra.mxu0 %v3028_v2  ;;  %v3033_v7 = vld [vmem:[#allocation2 + $0x88] sm:$0xff]   ;;  %v3036_v10 = vld [vmem:[#allocation2 + $0x10] sm:$0xff]   ;;  %v442_v29 = vunpack.c.0.s8 %v441_v23 }
  0x17   :  { %2720 = vmatpush3.bf16.msra.mxu1 %v3029_v3  ;;  %2699 = vmatprep.subr.bf16.mxu0 %v3030_v4  ;;  %v3037_v11 = vld [vmem:[#allocation2 + $0x90] sm:$0xff]   ;;  %v3038_v12 = vld [vmem:[#allocation2 + $0x58] sm:$0xff]   ;;  %v3042_v16 = vld [vmem:[#allocation2 + $0x60] sm:$0xff]  }
  0x18   :  { %2721 = vmatprep.subr.bf16.mxu1 %v3031_v5  ;;  %v3039_v13 = vld [vmem:[#allocation2 + $0xd8] sm:$0xff]   ;;  %v3043_v17 = vld [vmem:[#allocation2 + $0xe0] sm:$0xff]   ;;  %v3046_v20 = vld [vmem:[#allocation2 + $0x68] sm:$0xff]   ;;  %v3344_v35 = vsub.s32 %v442_v29, %v444_v30 }
  0x19   :  { %v3040_v14 = vld [vmem:[#allocation2 + $0x18] sm:$0xff]   ;;  %v3044_v18 = vld [vmem:[#allocation2 + $0x20] sm:$0xff]   ;;  %v3047_v21 = vld [vmem:[#allocation2 + $0xe8] sm:$0xff]  }
  0x1a   :  { %2700 = vmatpush3.bf16.msra.mxu0 %v3032_v6  ;;  %v3041_v15 = vld [vmem:[#allocation2 + $0x98] sm:$0xff]   ;;  %v3045_v19 = vld [vmem:[#allocation2 + $0xa0] sm:$0xff]   ;;  %v3048_v25 = vld [vmem:[#allocation2 + $0x28] sm:$0xff]  }
  0x1b   :  { %2722 = vmatpush3.bf16.msra.mxu1 %v3033_v7  ;;  %2701 = vmatprep.subr.bf16.mxu0 %v3034_v8  ;;  %v3049_v26 = vld [vmem:[#allocation2 + $0xa8] sm:$0xff]   ;;  %v3050_v27 = vld [vmem:[#allocation2 + $0x70] sm:$0xff]   ;;  %v3054_v33 = vld [vmem:[#allocation2 + $0x78] sm:$0xff]  }
  0x1c   :  { %2723 = vmatprep.subr.bf16.mxu1 %v3035_v9  ;;  %v3051_v28 = vld [vmem:[#allocation2 + $0xf0] sm:$0xff]   ;;  %v3055_v34 = vld [vmem:[#allocation2 + $0xf8] sm:$0xff]   ;;  %v42_v38 = vld [vmem:[%s3475_s0] sm:$0xff] }
  0x1d   :  { %v3052_v31 = vld [vmem:[#allocation2 + $0x30] sm:$0xff]   ;;  %v3056_v36 = vld [vmem:[#allocation2 + $0x38] sm:$0xff]   ;;  %v439_v39 = vcombine.high %v42_v38, %v42_v38  ;;  %v446_v40 = vrot.slane %v42_v38, %v3344_v35  ;;  %v3059_v41 = vld [vmem:[#allocation2 + $0x140] sm:$0xff]  }
  0x1e   :  { %2702 = vmatpush3.bf16.msra.mxu0 %v3036_v10  ;;  %v3053_v32 = vld [vmem:[#allocation2 + $0xb0] sm:$0xff]   ;;  %v3057_v37 = vld [vmem:[#allocation2 + $0xb8] sm:$0xff]   ;;  %v3060_v42 = vld [vmem:[#allocation2 + $0x1c0] sm:$0xff]  }
  0x1f   :  { %2724 = vmatpush3.bf16.msra.mxu1 %v3037_v11  ;;  %2703 = vmatprep.subr.bf16.mxu0 %v3038_v12  ;;  %v454_v43 = vcombine.high %v446_v40, %v446_v40  ;;  %v462_v44 = vrot.slane %v446_v40, %v3344_v35  ;;  %v3352_v45 = vrot.slane %v439_v39, %v3344_v35  ;;  %v3061_v46 = vld [vmem:[#allocation2 + $0x100] sm:$0xff]   ;;  %v3063_v51 = vld [vmem:[#allocation2 + $0x148] sm:$0xff]   ;;  %v3067_v58 = vld [vmem:[#allocation2 + $0x150] sm:$0xff]  }
  0x20   :  { %2725 = vmatprep.subr.bf16.mxu1 %v3039_v13  ;;  %v3062_v48 = vld [vmem:[#allocation2 + $0x180] sm:$0xff]   ;;  %v3064_v53 = vld [vmem:[#allocation2 + $0x1c8] sm:$0xff]   ;;  %v3068_v59 = vld [vmem:[#allocation2 + $0x1d0] sm:$0xff]  }
  0x21   :  { %v476_v47 = vrot.slane %v454_v43, %v3344_v35  ;;  %v455_v49 = vcombine.high %v3352_v45, %v3352_v45  ;;  %v484_v50 = vcombine.high %v462_v44, %v462_v44  ;;  %v3065_v55 = vld [vmem:[#allocation2 + $0x108] sm:$0xff]   ;;  %v3069_v60 = vld [vmem:[#allocation2 + $0x110] sm:$0xff]   ;;  %v3071_v62 = vld [vmem:[#allocation2 + $0x158] sm:$0xff]  }
  0x22   :  { %2704 = vmatpush3.bf16.msra.mxu0 %v3040_v14  ;;  %v3066_v56 = vld [vmem:[#allocation2 + $0x188] sm:$0xff]   ;;  %v3070_v61 = vld [vmem:[#allocation2 + $0x190] sm:$0xff]   ;;  %v3072_v63 = vld [vmem:[#allocation2 + $0x1d8] sm:$0xff]  }
  0x23   :  { %2726 = vmatpush3.bf16.msra.mxu1 %v3041_v15  ;;  %2705 = vmatprep.subr.bf16.mxu0 %v3042_v16  ;;  %v486_v52 = vcombine.high %v476_v47, %v476_v47  ;;  %v483_v54 = vrot.slane %v455_v49, %v3344_v35  ;;  %v3073_v0 = vld [vmem:[#allocation2 + $0x118] sm:$0xff]   ;;  %v3075_v2 = vld [vmem:[#allocation2 + $0x160] sm:$0xff]   ;;  %v3079_v6 = vld [vmem:[#allocation2 + $0x168] sm:$0xff]  }
  0x24   :  { %2727 = vmatprep.subr.bf16.mxu1 %v3043_v17  ;;  %1794 = vmatprep.mubr.bf16.mxu0 %v476_v47  ;;  %v3074_v1 = vld [vmem:[#allocation2 + $0x198] sm:$0xff]   ;;  %v3076_v3 = vld [vmem:[#allocation2 + $0x1e0] sm:$0xff]   ;;  %v3080_v7 = vld [vmem:[#allocation2 + $0x1e8] sm:$0xff]  }
  0x25   :  { %1834 = vmatprep.mubr.bf16.mxu1 %v486_v52  ;;  %v487_v57 = vcombine.high %v483_v54, %v483_v54  ;;  %v3077_v4 = vld [vmem:[#allocation2 + $0x120] sm:$0xff]   ;;  %v3081_v8 = vld [vmem:[#allocation2 + $0x128] sm:$0xff]   ;;  %v3083_v10 = vld [vmem:[#allocation2 + $0x170] sm:$0xff]  }
  0x26   :  { %2706 = vmatpush3.bf16.msra.mxu0 %v3044_v18  ;;  %v3078_v5 = vld [vmem:[#allocation2 + $0x1a0] sm:$0xff]   ;;  %v3082_v9 = vld [vmem:[#allocation2 + $0x1a8] sm:$0xff]   ;;  %v3084_v11 = vld [vmem:[#allocation2 + $0x1f0] sm:$0xff]   ;;  %v469_v18 = vrot.slane %v3352_v45, %v3344_v35 }
  0x27   :  { %2728 = vmatpush3.bf16.msra.mxu1 %v3045_v19  ;;  %2707 = vmatprep.subr.bf16.mxu0 %v3046_v20  ;;  %v3085_v12 = vld [vmem:[#allocation2 + $0x130] sm:$0xff]   ;;  %v3087_v14 = vld [vmem:[#allocation2 + $0x178] sm:$0xff]   ;;  %v3091_v19 = vld [vmem:[#allocation2 + $0x240] sm:$0xff]  }
  0x28   :  { %2729 = vmatprep.subr.bf16.mxu1 %v3047_v21  ;;  %v3086_v13 = vld [vmem:[#allocation2 + $0x1b0] sm:$0xff]   ;;  %v3088_v15 = vld [vmem:[#allocation2 + $0x1f8] sm:$0xff]   ;;  %v3092_v20 = vld [vmem:[#allocation2 + $0x2c0] sm:$0xff]   ;;  %v485_v23 = vcombine.high %v469_v18, %v469_v18 }
  0x29   :  { %v3089_v16 = vld [vmem:[#allocation2 + $0x138] sm:$0xff]   ;;  %v3093_v21 = vld [vmem:[#allocation2 + $0x200] sm:$0xff]   ;;  %v3095_v24 = vld [vmem:[#allocation2 + $0x248] sm:$0xff]  }
  0x2a   :  { %2708 = vmatpush3.bf16.msra.mxu0 %v3048_v25  ;;  %v3090_v17 = vld [vmem:[#allocation2 + $0x1b8] sm:$0xff]   ;;  %v3094_v22 = vld [vmem:[#allocation2 + $0x280] sm:$0xff]   ;;  %v3096_v25 = vld [vmem:[#allocation2 + $0x2c8] sm:$0xff]  }
  0x2b   :  { %2730 = vmatpush3.bf16.msra.mxu1 %v3049_v26  ;;  %2709 = vmatprep.subr.bf16.mxu0 %v3050_v27  ;;  %v3097_v26 = vld [vmem:[#allocation2 + $0x208] sm:$0xff]   ;;  %v3100_v29 = vld [vmem:[#allocation2 + $0x2d0] sm:$0xff]   ;;  %v3108_v38 = vld [vmem:[#allocation2 + $0x2e0] sm:$0xff]  }
  0x2c   :  { %2731 = vmatprep.subr.bf16.mxu1 %v3051_v28  ;;  %v3098_v27 = vld [vmem:[#allocation2 + $0x288] sm:$0xff]   ;;  %v3099_v28 = vld [vmem:[#allocation2 + $0x250] sm:$0xff]   ;;  %v3109_v39 = vld [vmem:[#allocation2 + $0x220] sm:$0xff]  }
  0x2d   :  { %v3101_v30 = vld [vmem:[#allocation2 + $0x210] sm:$0xff]   ;;  %v3110_v40 = vld [vmem:[#allocation2 + $0x2a0] sm:$0xff]   ;;  %v3113_v43 = vld [vmem:[#allocation2 + $0x228] sm:$0xff]  }
  0x2e   :  { %2710 = vmatpush3.bf16.msra.mxu0 %v3052_v31  ;;  %v3102_v31 = vld [vmem:[#allocation2 + $0x290] sm:$0xff]   ;;  %v3119_v49 = vld [vmem:[#allocation2 + $0x278] sm:$0xff]   ;;  %v43_v52 = vld [vmem:[%s3475_s0 + $0x8] sm:$0xff] }
  0x2f   :  { %2732 = vmatpush3.bf16.msra.mxu1 %v3053_v32  ;;  %2711 = vmatprep.subr.bf16.mxu0 %v3054_v33  ;;  %v3103_v32 = vld [vmem:[#allocation2 + $0x258] sm:$0xff]   ;;  %v3115_v45 = vld [vmem:[#allocation2 + $0x270] sm:$0xff]  }
  0x30   :  { %2733 = vmatprep.subr.bf16.mxu1 %v3055_v34  ;;  %v3104_v33 = vld [vmem:[#allocation2 + $0x2d8] sm:$0xff]   ;;  %v3117_v47 = vld [vmem:[#allocation2 + $0x230] sm:$0xff]  }
  0x31   :  { %v3105_v34 = vld [vmem:[#allocation2 + $0x218] sm:$0xff]  }
  0x32   :  { %2712 = vmatpush3.bf16.msra.mxu0 %v3056_v36  ;;  %v3106_v36 = vld [vmem:[#allocation2 + $0x298] sm:$0xff]  }
  0x33   :  { %2734 = vmatpush3.bf16.msra.mxu1 %v3057_v37  ;;  %2741 = vmatprep.subr.bf16.mxu0 %v3059_v41  ;;  %v3107_v37 = vld [vmem:[#allocation2 + $0x260] sm:$0xff]   ;;  %v3111_v41 = vld [vmem:[#allocation2 + $0x268] sm:$0xff]  }
  0x34   :  { %2763 = vmatprep.subr.bf16.mxu1 %v3060_v42  ;;  %v3112_v42 = vld [vmem:[#allocation2 + $0x2e8] sm:$0xff]  }
  0x35   :  { %1795 = vmatmul.mubr.bf16.vlgmr.msra.gmra.mrb[0].mxu0 %v462_v44  ;;  %v3114_v44 = vld [vmem:[#allocation2 + $0x2a8] sm:$0xff]  }
  0x36   :  { %2742 = vmatpush3.bf16.msra.mxu0 %v3061_v46  ;;  %1835 = vmatmul.mubr.bf16.vlgmr.msra.gmra.mrb[0].mxu1 %v484_v50  ;;  %v3116_v46 = vld [vmem:[#allocation2 + $0x2f0] sm:$0xff]   ;;  %v3120_v50 = vld [vmem:[#allocation2 + $0x2f8] sm:$0xff]  }
  0x37   :  { %2743 = vmatprep.subr.bf16.mxu0 %v3063_v51  ;;  %2764 = vmatpush3.bf16.msra.mxu1 %v3062_v48  ;;  %v3118_v48 = vld [vmem:[#allocation2 + $0x2b0] sm:$0xff]   ;;  %v3121_v51 = vld [vmem:[#allocation2 + $0x238] sm:$0xff]  }
  0x38   :  { %1874 = vmatprep.mubr.bf16.mxu0 %v483_v54  ;;  %2765 = vmatprep.subr.bf16.mxu1 %v3064_v53  ;;  %v3122_v53 = vld [vmem:[#allocation2 + $0x2b8] sm:$0xff]   ;;  %v495_v54 = vrot.slane %v43_v52, %v3344_v35 }
  0x39   :  { %1914 = vmatprep.mubr.bf16.mxu1 %v487_v57 }
  0x3a   :  { %2744 = vmatpush3.bf16.msra.mxu0 %v3065_v55  ;;  %v488_v55 = vcombine.high %v43_v52, %v43_v52  ;;  %v503_v57 = vcombine.high %v495_v54, %v495_v54  ;;  %v3172_v52 = vld [vmem:[#allocation2 + $0x460] sm:$0xff]  }
  0x3b   :  { %2745 = vmatprep.subr.bf16.mxu0 %v3067_v58  ;;  %2766 = vmatpush3.bf16.msra.mxu1 %v3066_v56  ;;  %v3123_v56 = vld [vmem:[#allocation2 + $0x340] sm:$0xff]   ;;  %v511_v58 = vrot.slane %v495_v54, %v3344_v35 }
  0x3c   :  { %2767 = vmatprep.subr.bf16.mxu1 %v3068_v59  ;;  %v3124_v59 = vld [vmem:[#allocation2 + $0x3c0] sm:$0xff]  }
  0x3d   :  { %v3174_v54 = vld [vmem:[#allocation2 + $0x420] sm:$0xff]  }
  0x3e   :  { %2746 = vmatpush3.bf16.msra.mxu0 %v3069_v60  ;;  %v3366_v60 = vrot.slane %v488_v55, %v3344_v35  ;;  %v3175_v55 = vld [vmem:[#allocation2 + $0x4a0] sm:$0xff]  }
  0x3f   :  { %2747 = vmatprep.subr.bf16.mxu0 %v3071_v62  ;;  %2768 = vmatpush3.bf16.msra.mxu1 %v3070_v61  ;;  %v3125_v61 = vld [vmem:[#allocation2 + $0x300] sm:$0xff]   ;;  %v525_v62 = vrot.slane %v503_v57, %v3344_v35  ;;  %v3177_v57 = vld [vmem:[#allocation2 + $0x4e8] sm:$0xff]  }
  0x40   :  { %2769 = vmatprep.subr.bf16.mxu1 %v3072_v63  ;;  %v3126_v63 = vld [vmem:[#allocation2 + $0x380] sm:$0xff]  }
  0x42   :  { %2748 = vmatpush3.bf16.msra.mxu0 %v3073_v0  ;;  %v504_v0 = vcombine.high %v3366_v60, %v3366_v60 }
  0x43   :  { %2749 = vmatprep.subr.bf16.mxu0 %v3075_v2  ;;  %2770 = vmatpush3.bf16.msra.mxu1 %v3074_v1  ;;  %v533_v1 = vcombine.high %v511_v58, %v511_v58  ;;  %v3127_v2 = vld [vmem:[#allocation2 + $0x348] sm:$0xff]  }
  0x44   :  { %2771 = vmatprep.subr.bf16.mxu1 %v3076_v3  ;;  %v535_v3 = vcombine.high %v525_v62, %v525_v62 }
  0x46   :  { %2750 = vmatpush3.bf16.msra.mxu0 %v3077_v4  ;;  %v3128_v4 = vld [vmem:[#allocation2 + $0x3c8] sm:$0xff]  }
  0x47   :  { %2751 = vmatprep.subr.bf16.mxu0 %v3079_v6  ;;  %2772 = vmatpush3.bf16.msra.mxu1 %v3078_v5  ;;  %v532_v5 = vrot.slane %v504_v0, %v3344_v35  ;;  %v3129_v6 = vld [vmem:[#allocation2 + $0x308] sm:$0xff]   ;;  %v3184_v0 = vld [vmem:[#allocation2 + $0x478] sm:$0xff]  }
  0x48   :  { %2773 = vmatprep.subr.bf16.mxu1 %v3080_v7  ;;  %v3130_v7 = vld [vmem:[#allocation2 + $0x388] sm:$0xff]  }
  0x4a   :  { %2752 = vmatpush3.bf16.msra.mxu0 %v3081_v8  ;;  %v536_v8 = vcombine.high %v532_v5, %v532_v5 }
  0x4b   :  { %2753 = vmatprep.subr.bf16.mxu0 %v3083_v10  ;;  %2774 = vmatpush3.bf16.msra.mxu1 %v3082_v9  ;;  %v3131_v9 = vld [vmem:[#allocation2 + $0x350] sm:$0xff]  }
  0x4c   :  { %2775 = vmatprep.subr.bf16.mxu1 %v3084_v11  ;;  %v3132_v10 = vld [vmem:[#allocation2 + $0x3d0] sm:$0xff]  }
  0x4d   :  { %v3133_v11 = vld [vmem:[#allocation2 + $0x310] sm:$0xff]  }
  0x4e   :  { %2754 = vmatpush3.bf16.msra.mxu0 %v3085_v12  ;;  %v3134_v12 = vld [vmem:[#allocation2 + $0x390] sm:$0xff]  }
  0x4f   :  { %2755 = vmatprep.subr.bf16.mxu0 %v3087_v14  ;;  %2776 = vmatpush3.bf16.msra.mxu1 %v3086_v13  ;;  %v3135_v13 = vld [vmem:[#allocation2 + $0x358] sm:$0xff]  }
  0x50   :  { %2777 = vmatprep.subr.bf16.mxu1 %v3088_v15  ;;  %v3136_v14 = vld [vmem:[#allocation2 + $0x3d8] sm:$0xff]  }
  0x51   :  { %v3137_v15 = vld [vmem:[#allocation2 + $0x318] sm:$0xff]  }
  0x52   :  { %2756 = vmatpush3.bf16.msra.mxu0 %v3089_v16  ;;  %v3138_v16 = vld [vmem:[#allocation2 + $0x398] sm:$0xff]  }
  0x53   :  { %2785 = vmatprep.subr.bf16.mxu0 %v3091_v19  ;;  %2778 = vmatpush3.bf16.msra.mxu1 %v3090_v17  ;;  %v3139_v17 = vld [vmem:[#allocation2 + $0x360] sm:$0xff]  }
  0x54   :  { %2807 = vmatprep.subr.bf16.mxu1 %v3092_v20  ;;  %v3141_v19 = vld [vmem:[#allocation2 + $0x320] sm:$0xff]  }
  0x55   :  { %1875 = vmatmul.mubr.bf16.vlgmr.msra.gmra.mrb[4].mxu0 %v469_v18  ;;  %v3140_v18 = vld [vmem:[#allocation2 + $0x3e0] sm:$0xff]  }
  0x56   :  { %2786 = vmatpush3.bf16.msra.mxu0 %v3093_v21  ;;  %1915 = vmatmul.mubr.bf16.vlgmr.msra.gmra.mrb[4].mxu1 %v485_v23  ;;  %v3142_v20 = vld [vmem:[#allocation2 + $0x3a0] sm:$0xff]   ;;  %v3143_v21 = vld [vmem:[#allocation2 + $0x368] sm:$0xff]  }
  0x57   :  { %2787 = vmatprep.subr.bf16.mxu0 %v3095_v24  ;;  %2808 = vmatpush3.bf16.msra.mxu1 %v3094_v22  ;;  %v3144_v22 = vld [vmem:[#allocation2 + $0x3e8] sm:$0xff]  }
  0x58   :  { %2809 = vmatprep.subr.bf16.mxu1 %v3096_v25  ;;  %1954 = vmatprep.mubr.bf16.mxu0 %v525_v62  ;;  %v3145_v23 = vld [vmem:[#allocation2 + $0x328] sm:$0xff]   ;;  %v3147_v25 = vld [vmem:[#allocation2 + $0x370] sm:$0xff]  }
  0x59   :  { %1994 = vmatprep.mubr.bf16.mxu1 %v535_v3  ;;  %v3146_v24 = vld [vmem:[#allocation2 + $0x3a8] sm:$0xff]   ;;  %v3182_v62 = vld [vmem:[#allocation2 + $0x430] sm:$0xff]  }
  0x5a   :  { %2788 = vmatpush3.bf16.msra.mxu0 %v3097_v26  ;;  %v3148_v26 = vld [vmem:[#allocation2 + $0x3f0] sm:$0xff]  }
  0x5b   :  { %2789 = vmatprep.subr.bf16.mxu0 %v3099_v28  ;;  %2810 = vmatpush3.bf16.msra.mxu1 %v3098_v27  ;;  %v3149_v27 = vld [vmem:[#allocation2 + $0x330] sm:$0xff]  }
  0x5c   :  { %2811 = vmatprep.subr.bf16.mxu1 %v3100_v29  ;;  %v3150_v28 = vld [vmem:[#allocation2 + $0x3b0] sm:$0xff]   ;;  %v3151_v29 = vld [vmem:[#allocation2 + $0x378] sm:$0xff]  }
  0x5d   :  { %v44_v3 = vld [vmem:[%s3475_s0 + $0x10] sm:$0xff] }
  0x5e   :  { %2790 = vmatpush3.bf16.msra.mxu0 %v3101_v30  ;;  %v3152_v30 = vld [vmem:[#allocation2 + $0x3f8] sm:$0xff]  }
  0x5f   :  { %2791 = vmatprep.subr.bf16.mxu0 %v3103_v32  ;;  %2812 = vmatpush3.bf16.msra.mxu1 %v3102_v31  ;;  %v3153_v31 = vld [vmem:[#allocation2 + $0x338] sm:$0xff]  }
  0x60   :  { %2813 = vmatprep.subr.bf16.mxu1 %v3104_v33  ;;  %v3154_v32 = vld [vmem:[#allocation2 + $0x3b8] sm:$0xff]   ;;  %v518_v33 = vrot.slane %v3366_v60, %v3344_v35  ;;  %v3180_v60 = vld [vmem:[#allocation2 + $0x470] sm:$0xff]  }
  0x62   :  { %2792 = vmatpush3.bf16.msra.mxu0 %v3105_v34  ;;  %v3156_v34 = vld [vmem:[#allocation2 + $0x440] sm:$0xff]  }
  0x63   :  { %2793 = vmatprep.subr.bf16.mxu0 %v3107_v37  ;;  %2814 = vmatpush3.bf16.msra.mxu1 %v3106_v36  ;;  %v3157_v36 = vld [vmem:[#allocation2 + $0x4c0] sm:$0xff]  }
  0x64   :  { %2815 = vmatprep.subr.bf16.mxu1 %v3108_v38  ;;  %v3158_v37 = vld [vmem:[#allocation2 + $0x400] sm:$0xff]  }
  0x65   :  { %v3159_v38 = vld [vmem:[#allocation2 + $0x480] sm:$0xff]  }
  0x66   :  { %2794 = vmatpush3.bf16.msra.mxu0 %v3109_v39  ;;  %v534_v39 = vcombine.high %v518_v33, %v518_v33 }
  0x67   :  { %2795 = vmatprep.subr.bf16.mxu0 %v3111_v41  ;;  %2816 = vmatpush3.bf16.msra.mxu1 %v3110_v40  ;;  %v3160_v40 = vld [vmem:[#allocation2 + $0x448] sm:$0xff]  }
  0x68   :  { %2817 = vmatprep.subr.bf16.mxu1 %v3112_v42  ;;  %v3161_v41 = vld [vmem:[#allocation2 + $0x4c8] sm:$0xff]  }
  0x69   :  { %v3162_v42 = vld [vmem:[#allocation2 + $0x408] sm:$0xff]  }
  0x6a   :  { %2796 = vmatpush3.bf16.msra.mxu0 %v3113_v43  ;;  %v3163_v43 = vld [vmem:[#allocation2 + $0x488] sm:$0xff]  }
  0x6b   :  { %2797 = vmatprep.subr.bf16.mxu0 %v3115_v45  ;;  %2818 = vmatpush3.bf16.msra.mxu1 %v3114_v44  ;;  %v3164_v44 = vld [vmem:[#allocation2 + $0x450] sm:$0xff]  }
  0x6c   :  { %2819 = vmatprep.subr.bf16.mxu1 %v3116_v46  ;;  %v3165_v45 = vld [vmem:[#allocation2 + $0x4d0] sm:$0xff]  }
  0x6d   :  { %v3166_v46 = vld [vmem:[#allocation2 + $0x410] sm:$0xff]  }
  0x6e   :  { %2798 = vmatpush3.bf16.msra.mxu0 %v3117_v47  ;;  %v3167_v47 = vld [vmem:[#allocation2 + $0x490] sm:$0xff]  }
  0x6f   :  { %2799 = vmatprep.subr.bf16.mxu0 %v3119_v49  ;;  %2820 = vmatpush3.bf16.msra.mxu1 %v3118_v48  ;;  %v3168_v48 = vld [vmem:[#allocation2 + $0x458] sm:$0xff]  }
  0x70   :  { %2821 = vmatprep.subr.bf16.mxu1 %v3120_v50  ;;  %v3169_v49 = vld [vmem:[#allocation2 + $0x4d8] sm:$0xff]  }
  0x71   :  { %v3170_v50 = vld [vmem:[#allocation2 + $0x418] sm:$0xff]  }
  0x72   :  { %2800 = vmatpush3.bf16.msra.mxu0 %v3121_v51  ;;  %v3171_v51 = vld [vmem:[#allocation2 + $0x498] sm:$0xff]  }
  0x73   :  { %2829 = vmatprep.subr.bf16.mxu0 %v3123_v56  ;;  %2822 = vmatpush3.bf16.msra.mxu1 %v3122_v53  ;;  %v3173_v53 = vld [vmem:[#allocation2 + $0x4e0] sm:$0xff]   ;;  %v3176_v56 = vld [vmem:[#allocation2 + $0x468] sm:$0xff]  }
  0x74   :  { %2851 = vmatprep.subr.bf16.mxu1 %v3124_v59  ;;  %v3179_v59 = vld [vmem:[#allocation2 + $0x4a8] sm:$0xff]  }
  0x75   :  { %1955 = vmatmul.mubr.bf16.vlgmr.msra.gmra.mrb[8].mxu0 %v511_v58  ;;  %v3178_v58 = vld [vmem:[#allocation2 + $0x428] sm:$0xff]  }
  0x76   :  { %2830 = vmatpush3.bf16.msra.mxu0 %v3125_v61  ;;  %1995 = vmatmul.mubr.bf16.vlgmr.msra.gmra.mrb[8].mxu1 %v533_v1  ;;  %v3181_v61 = vld [vmem:[#allocation2 + $0x4f0] sm:$0xff]   ;;  %v3185_v1 = vld [vmem:[#allocation2 + $0x4f8] sm:$0xff]  }
  0x77   :  { %2831 = vmatprep.subr.bf16.mxu0 %v3127_v2  ;;  %2852 = vmatpush3.bf16.msra.mxu1 %v3126_v63  ;;  %v3183_v63 = vld [vmem:[#allocation2 + $0x4b0] sm:$0xff]   ;;  %v3186_v2 = vld [vmem:[#allocation2 + $0x438] sm:$0xff]  }
  0x78   :  { %2034 = vmatprep.mubr.bf16.mxu0 %v532_v5  ;;  %2853 = vmatprep.subr.bf16.mxu1 %v3128_v4  ;;  %v3187_v4 = vld [vmem:[#allocation2 + $0x4b8] sm:$0xff]   ;;  %v544_v5 = vrot.slane %v44_v3, %v3344_v35 }
  0x79   :  { %2074 = vmatprep.mubr.bf16.mxu1 %v536_v8 }
  0x7a   :  { %2832 = vmatpush3.bf16.msra.mxu0 %v3129_v6  ;;  %v537_v6 = vcombine.high %v44_v3, %v44_v3  ;;  %v552_v8 = vcombine.high %v544_v5, %v544_v5  ;;  %v3224_v3 = vld [vmem:[%s3478_s3 + $0x18] sm:$0xff]  }
  0x7b   :  { %2833 = vmatprep.subr.bf16.mxu0 %v3131_v9  ;;  %2854 = vmatpush3.bf16.msra.mxu1 %v3130_v7  ;;  %v3188_v7 = vld [vmem:[#allocation2 + $0x540] sm:$0xff]   ;;  %v560_v9 = vrot.slane %v544_v5, %v3344_v35 }
  0x7c   :  { %2855 = vmatprep.subr.bf16.mxu1 %v3132_v10  ;;  %v3189_v10 = vld [vmem:[#allocation2 + $0x5c0] sm:$0xff]  }
  0x7e   :  { %2834 = vmatpush3.bf16.msra.mxu0 %v3133_v11  ;;  %v3380_v11 = vrot.slane %v537_v6, %v3344_v35 }
  0x7f   :  { %2835 = vmatprep.subr.bf16.mxu0 %v3135_v13  ;;  %2856 = vmatpush3.bf16.msra.mxu1 %v3134_v12  ;;  %v3190_v12 = vld [vmem:[#allocation2 + $0x500] sm:$0xff]   ;;  %v574_v13 = vrot.slane %v552_v8, %v3344_v35 }
  0x80   :  { %2857 = vmatprep.subr.bf16.mxu1 %v3136_v14  ;;  %v3191_v14 = vld [vmem:[#allocation2 + $0x580] sm:$0xff]  }
  0x82   :  { %2836 = vmatpush3.bf16.msra.mxu0 %v3137_v15  ;;  %v553_v15 = vcombine.high %v3380_v11, %v3380_v11 }
  0x83   :  { %2837 = vmatprep.subr.bf16.mxu0 %v3139_v17  ;;  %2858 = vmatpush3.bf16.msra.mxu1 %v3138_v16  ;;  %v582_v16 = vcombine.high %v560_v9, %v560_v9  ;;  %v3192_v17 = vld [vmem:[#allocation2 + $0x548] sm:$0xff]  }
  0x84   :  { %2859 = vmatprep.subr.bf16.mxu1 %v3140_v18  ;;  %v584_v18 = vcombine.high %v574_v13, %v574_v13 }
  0x86   :  { %2838 = vmatpush3.bf16.msra.mxu0 %v3141_v19  ;;  %v3193_v19 = vld [vmem:[#allocation2 + $0x5c8] sm:$0xff]  }
  0x87   :  { %2839 = vmatprep.subr.bf16.mxu0 %v3143_v21  ;;  %2860 = vmatpush3.bf16.msra.mxu1 %v3142_v20  ;;  %v581_v20 = vrot.slane %v553_v15, %v3344_v35  ;;  %v3194_v21 = vld [vmem:[#allocation2 + $0x508] sm:$0xff]  }
  0x88   :  { %2861 = vmatprep.subr.bf16.mxu1 %v3144_v22  ;;  %v3195_v22 = vld [vmem:[#allocation2 + $0x588] sm:$0xff]  }
  0x8a   :  { %2840 = vmatpush3.bf16.msra.mxu0 %v3145_v23  ;;  %v585_v23 = vcombine.high %v581_v20, %v581_v20 }
  0x8b   :  { %2841 = vmatprep.subr.bf16.mxu0 %v3147_v25  ;;  %2862 = vmatpush3.bf16.msra.mxu1 %v3146_v24  ;;  %v3196_v24 = vld [vmem:[#allocation2 + $0x550] sm:$0xff]  }
  0x8c   :  { %2863 = vmatprep.subr.bf16.mxu1 %v3148_v26  ;;  %v3197_v25 = vld [vmem:[#allocation2 + $0x5d0] sm:$0xff]  }
  0x8d   :  { %v3198_v26 = vld [vmem:[#allocation2 + $0x510] sm:$0xff]  }
  0x8e   :  { %2842 = vmatpush3.bf16.msra.mxu0 %v3149_v27  ;;  %v3199_v27 = vld [vmem:[#allocation2 + $0x590] sm:$0xff]  }
  0x8f   :  { %2843 = vmatprep.subr.bf16.mxu0 %v3151_v29  ;;  %2864 = vmatpush3.bf16.msra.mxu1 %v3150_v28  ;;  %v3200_v28 = vld [vmem:[#allocation2 + $0x558] sm:$0xff]  }
  0x90   :  { %2865 = vmatprep.subr.bf16.mxu1 %v3152_v30  ;;  %v3201_v29 = vld [vmem:[#allocation2 + $0x5d8] sm:$0xff]  }
  0x91   :  { %v3202_v30 = vld [vmem:[#allocation2 + $0x518] sm:$0xff]  }
  0x92   :  { %2844 = vmatpush3.bf16.msra.mxu0 %v3153_v31  ;;  %v3203_v31 = vld [vmem:[#allocation2 + $0x598] sm:$0xff]  }
  0x93   :  { %2873 = vmatprep.subr.bf16.mxu0 %v3156_v34  ;;  %2866 = vmatpush3.bf16.msra.mxu1 %v3154_v32  ;;  %v3204_v32 = vld [vmem:[#allocation2 + $0x560] sm:$0xff]  }
  0x94   :  { %2895 = vmatprep.subr.bf16.mxu1 %v3157_v36  ;;  %v3206_v34 = vld [vmem:[#allocation2 + $0x520] sm:$0xff]  }
  0x95   :  { %2035 = vmatmul.mubr.bf16.vlgmr.msra.gmra.mrb[12].mxu0 %v518_v33  ;;  %v3205_v33 = vld [vmem:[#allocation2 + $0x5e0] sm:$0xff]  }
  0x96   :  { %2874 = vmatpush3.bf16.msra.mxu0 %v3158_v37  ;;  %2075 = vmatmul.mubr.bf16.vlgmr.msra.gmra.mrb[12].mxu1 %v534_v39  ;;  %v3207_v36 = vld [vmem:[#allocation2 + $0x5a0] sm:$0xff]   ;;  %v3208_v37 = vld [vmem:[#allocation2 + $0x568] sm:$0xff]  }
  0x97   :  { %2875 = vmatprep.subr.bf16.mxu0 %v3160_v40  ;;  %2896 = vmatpush3.bf16.msra.mxu1 %v3159_v38  ;;  %v3209_v38 = vld [vmem:[#allocation2 + $0x5e8] sm:$0xff]  }
  0x98   :  { %2897 = vmatprep.subr.bf16.mxu1 %v3161_v41  ;;  %2114 = vmatprep.mubr.bf16.mxu0 %v574_v13  ;;  %v3210_v39 = vld [vmem:[#allocation2 + $0x528] sm:$0xff]   ;;  %v3212_v41 = vld [vmem:[#allocation2 + $0x570] sm:$0xff]  }
  0x99   :  { %2154 = vmatprep.mubr.bf16.mxu1 %v584_v18  ;;  %v3211_v40 = vld [vmem:[#allocation2 + $0x5a8] sm:$0xff]  }
  0x9a   :  { %2876 = vmatpush3.bf16.msra.mxu0 %v3162_v42  ;;  %v3213_v42 = vld [vmem:[#allocation2 + $0x5f0] sm:$0xff]  }
  0x9b   :  { %2877 = vmatprep.subr.bf16.mxu0 %v3164_v44  ;;  %2898 = vmatpush3.bf16.msra.mxu1 %v3163_v43  ;;  %v3214_v43 = vld [vmem:[#allocation2 + $0x530] sm:$0xff]  }
  0x9c   :  { %2899 = vmatprep.subr.bf16.mxu1 %v3165_v45  ;;  %v3215_v44 = vld [vmem:[#allocation2 + $0x5b0] sm:$0xff]   ;;  %v3216_v45 = vld [vmem:[#allocation2 + $0x578] sm:$0xff]  }
  0x9e   :  { %2878 = vmatpush3.bf16.msra.mxu0 %v3166_v46  ;;  %v3217_v46 = vld [vmem:[#allocation2 + $0x5f8] sm:$0xff]  }
  0x9f   :  { %2879 = vmatprep.subr.bf16.mxu0 %v3168_v48  ;;  %2900 = vmatpush3.bf16.msra.mxu1 %v3167_v47  ;;  %v3218_v47 = vld [vmem:[#allocation2 + $0x538] sm:$0xff]  }
  0xa0   :  { %2901 = vmatprep.subr.bf16.mxu1 %v3169_v49  ;;  %v3219_v48 = vld [vmem:[#allocation2 + $0x5b8] sm:$0xff]   ;;  %v567_v49 = vrot.slane %v3380_v11, %v3344_v35 }
  0xa2   :  { %2880 = vmatpush3.bf16.msra.mxu0 %v3170_v50  ;;  %v583_v50 = vcombine.high %v567_v49, %v567_v49 }
  0xa3   :  { %2881 = vmatprep.subr.bf16.mxu0 %v3172_v52  ;;  %2902 = vmatpush3.bf16.msra.mxu1 %v3171_v51  ;;  %v2486_v52 = vld [vmem:[%s3477_s2] ss:$0 sm:$0xff] }
  0xa4   :  { %2903 = vmatprep.subr.bf16.mxu1 %v3173_v53 }
  0xa6   :  { %2882 = vmatpush3.bf16.msra.mxu0 %v3174_v54 }
  0xa7   :  { %2883 = vmatprep.subr.bf16.mxu0 %v3176_v56  ;;  %2904 = vmatpush3.bf16.msra.mxu1 %v3175_v55 }
  0xa8   :  { %2905 = vmatprep.subr.bf16.mxu1 %v3177_v57 }
  0xaa   :  { %2884 = vmatpush3.bf16.msra.mxu0 %v3178_v58 }
  0xab   :  { %2885 = vmatprep.subr.bf16.mxu0 %v3180_v60  ;;  %2906 = vmatpush3.bf16.msra.mxu1 %v3179_v59 }
  0xac   :  { %2907 = vmatprep.subr.bf16.mxu1 %v3181_v61 }
  0xae   :  { %2886 = vmatpush3.bf16.msra.mxu0 %v3182_v62 }
  0xaf   :  { %2887 = vmatprep.subr.bf16.mxu0 %v3184_v0  ;;  %2908 = vmatpush3.bf16.msra.mxu1 %v3183_v63  ;;  %v3221_v63 = vld [vmem:[%s3478_s3] sm:$0xff]   ;;  %v3289_v0 = vmov 0.0  }
  0xb0   :  { %2909 = vmatprep.subr.bf16.mxu1 %v3185_v1  ;;  %v3222_v1 = vld [vmem:[%s3478_s3 + $0x8] sm:$0xff]  }
  0xb2   :  { %2888 = vmatpush3.bf16.msra.mxu0 %v3186_v2  ;;  %v3223_v2 = vld [vmem:[%s3478_s3 + $0x10] sm:$0xff]  }
  0xb3   :  { %2917 = vmatprep.subr.bf16.mxu0 %v3188_v7  ;;  %2910 = vmatpush3.bf16.msra.mxu1 %v3187_v4  ;;  %v3225_v4 = vld [vmem:[%s3478_s3 + $0x20] sm:$0xff]   ;;  %v3226_v7 = vld [vmem:[%s3478_s3 + $0x28] sm:$0xff]  }
  0xb4   :  { %2939 = vmatprep.subr.bf16.mxu1 %v3189_v10 }
  0xb5   :  { %2115 = vmatmul.mubr.bf16.vlgmr.msra.gmra.mrb[16].mxu0 %v560_v9 }
  0xb6   :  { %2918 = vmatpush3.bf16.msra.mxu0 %v3190_v12  ;;  %2155 = vmatmul.mubr.bf16.vlgmr.msra.gmra.mrb[16].mxu1 %v582_v16 }
  0xb7   :  { %2919 = vmatprep.subr.bf16.mxu0 %v3192_v17  ;;  %2940 = vmatpush3.bf16.msra.mxu1 %v3191_v14  ;;  %v3227_v17 = vld [vmem:[%s3478_s3 + $0x30] sm:$0xff]  }
  0xb8   :  { %2194 = vmatprep.mubr.bf16.mxu0 %v581_v20  ;;  %2941 = vmatprep.subr.bf16.mxu1 %v3193_v19  ;;  %v3228_v19 = vld [vmem:[%s3478_s3 + $0x38] sm:$0xff]   ;;  %v3229_v20 = vld [vmem:[%s3480_s5] sm:$0xff]  }
  0xb9   :  { %2234 = vmatprep.mubr.bf16.mxu1 %v585_v23  ;;  %v3232_v23 = vld [vmem:[%s3480_s5 + $0x18] sm:$0xff]  }
  0xba   :  { %2920 = vmatpush3.bf16.msra.mxu0 %v3194_v21  ;;  %v3230_v21 = vld [vmem:[%s3480_s5 + $0x8] sm:$0xff]  }
  0xbb   :  { %2921 = vmatprep.subr.bf16.mxu0 %v3196_v24  ;;  %2942 = vmatpush3.bf16.msra.mxu1 %v3195_v22  ;;  %v3231_v22 = vld [vmem:[%s3480_s5 + $0x10] sm:$0xff]   ;;  %v3233_v24 = vld [vmem:[%s3480_s5 + $0x20] sm:$0xff]  }
  0xbc   :  { %2943 = vmatprep.subr.bf16.mxu1 %v3197_v25  ;;  %v3234_v25 = vld [vmem:[%s3480_s5 + $0x28] sm:$0xff]  }
  0xbe   :  { %2922 = vmatpush3.bf16.msra.mxu0 %v3198_v26 }
  0xbf   :  { %2923 = vmatprep.subr.bf16.mxu0 %v3200_v28  ;;  %2944 = vmatpush3.bf16.msra.mxu1 %v3199_v27 }
  0xc0   :  { %2945 = vmatprep.subr.bf16.mxu1 %v3201_v29 }
  0xc2   :  { %2924 = vmatpush3.bf16.msra.mxu0 %v3202_v30 }
  0xc3   :  { %2925 = vmatprep.subr.bf16.mxu0 %v3204_v32  ;;  %2946 = vmatpush3.bf16.msra.mxu1 %v3203_v31 }
  0xc4   :  { %2947 = vmatprep.subr.bf16.mxu1 %v3205_v33 }
  0xc6   :  { %2926 = vmatpush3.bf16.msra.mxu0 %v3206_v34 }
  0xc7   :  { %2927 = vmatprep.subr.bf16.mxu0 %v3208_v37  ;;  %2948 = vmatpush3.bf16.msra.mxu1 %v3207_v36 }
  0xc8   :  { %2949 = vmatprep.subr.bf16.mxu1 %v3209_v38 }
  0xca   :  { %2928 = vmatpush3.bf16.msra.mxu0 %v3210_v39 }
  0xcb   :  { %2929 = vmatprep.subr.bf16.mxu0 %v3212_v41  ;;  %2950 = vmatpush3.bf16.msra.mxu1 %v3211_v40 }
  0xcc   :  { %2951 = vmatprep.subr.bf16.mxu1 %v3213_v42 }
  0xce   :  { %2930 = vmatpush3.bf16.msra.mxu0 %v3214_v43 }
  0xcf   :  { %2931 = vmatprep.subr.bf16.mxu0 %v3216_v45  ;;  %2952 = vmatpush3.bf16.msra.mxu1 %v3215_v44 }
  0xd0   :  { %2953 = vmatprep.subr.bf16.mxu1 %v3217_v46 }
  0xd2   :  { %2932 = vmatpush3.bf16.msra.mxu0 %v3218_v47 }
  0xd3   :  { %2954 = vmatpush3.bf16.msra.mxu1 %v3219_v48  ;;  %2979 = vmatprep.subr.bf16.mxu0 %v3289_v0 }
  0xd4   :  { %2999 = vmatprep.subr.bf16.mxu1 %v3289_v0 }
  0xd5   :  { %2195 = vmatmul.mubr.bf16.vlgmr.msra.gmra.mrb[20].mxu0 %v567_v49 }
  0xd6   :  { %2235 = vmatmul.mubr.bf16.vlgmr.msra.gmra.mrb[20].mxu1 %v583_v50  ;;  %2980 = vmatpush3.bf16.msra.mxu0 %v3221_v63 }
  0xd7   :  { %2981 = vmatprep.subr.bf16.mxu0 %v3289_v0  ;;  %2995 = vmatprep.mubr.msk.bf16.mxu0 %vm3290_vm0, %v3289_v0 }
  0xd8   :  { %3015 = vmatprep.mubr.msk.bf16.mxu1 %vm3290_vm0, %v3289_v0  ;;  %3000 = vmatpush3.bf16.msra.mxu1 %v3229_v20 }
  0xd9   :  { %3001 = vmatprep.subr.bf16.mxu1 %v3289_v0 }
  0xda   :  { %2982 = vmatpush3.bf16.msra.mxu0 %v3222_v1 }
  0xdb   :  { %2983 = vmatprep.subr.bf16.mxu0 %v3289_v0 }
  0xdc   :  { %3002 = vmatpush3.bf16.msra.mxu1 %v3230_v21 }
  0xdd   :  { %3003 = vmatprep.subr.bf16.mxu1 %v3289_v0 }
  0xde   :  { %2984 = vmatpush3.bf16.msra.mxu0 %v3223_v2 }
  0xdf   :  { %2985 = vmatprep.subr.bf16.mxu0 %v3289_v0 }
  0xe0   :  { %3004 = vmatpush3.bf16.msra.mxu1 %v3231_v22 }
  0xe1   :  { %3005 = vmatprep.subr.bf16.mxu1 %v3289_v0 }
  0xe2   :  { %2986 = vmatpush3.bf16.msra.mxu0 %v3224_v3 }
  0xe3   :  { %2987 = vmatprep.subr.bf16.mxu0 %v3289_v0 }
  0xe4   :  { %3006 = vmatpush3.bf16.msra.mxu1 %v3232_v23 }
  0xe5   :  { %3007 = vmatprep.subr.bf16.mxu1 %v3289_v0 }
  0xe6   :  { %2988 = vmatpush3.bf16.msra.mxu0 %v3225_v4 }
  0xe7   :  { %2989 = vmatprep.subr.bf16.mxu0 %v3289_v0 }
  0xe8   :  { %3008 = vmatpush3.bf16.msra.mxu1 %v3233_v24 }
  0xe9   :  { %3009 = vmatprep.subr.bf16.mxu1 %v3289_v0 }
  0xea   :  { %2990 = vmatpush3.bf16.msra.mxu0 %v3226_v7 }
  0xeb   :  { %2991 = vmatprep.subr.bf16.mxu0 %v3289_v0 }
  0xec   :  { %3010 = vmatpush3.bf16.msra.mxu1 %v3234_v25 }
  0xed   :  { %3011 = vmatprep.subr.bf16.mxu1 %v3289_v0 }
  0xee   :  { %2992 = vmatpush3.bf16.msra.mxu0 %v3227_v17 }
  0xef   :  { %2993 = vmatprep.subr.bf16.mxu0 %v3289_v0 }
  0xf2   :  { %2994 = vmatpush3.bf16.msra.mxu0 %v3228_v19 }
 0x108   :  { %v2713_v51 = vpop.f32.mrb[0].mxu0 }
 0x109   :  { %v2714_v53 = vpop.f32.mrb[1].mxu0  ;;  %v2735_v54 = vpop.f32.mrb[0].mxu1 }
 0x10a   :  { %v2715_v55 = vadd.f32 %v2714_v53, %v2713_v51  ;;  %v2716_v56 = vpop.f32.mrb[2].mxu0  ;;  %v2736_v57 = vpop.f32.mrb[1].mxu1 }
 0x10b   :  { %v2717_v58 = vpop.f32.mrb[3].mxu0  ;;  %v2737_v35 = vadd.f32 %v2736_v57, %v2735_v54  ;;  %v2738_v60 = vpop.f32.mrb[2].mxu1 }
 0x10c   :  { %v1797_v59 = vadd.f32 %v2715_v55, %v2486_v52  ;;  %v2739_v61 = vpop.f32.mrb[3].mxu1 }
 0x10e   :  { %v1837_v62 = vadd.f32 %v2737_v35, %v1797_v59 }
 0x128   :  { %v2757_v5 = vpop.f32.mrb[4].mxu0 }
 0x129   :  { %v2758_v6 = vpop.f32.mrb[5].mxu0  ;;  %v2779_v8 = vpop.f32.mrb[4].mxu1 }
 0x12a   :  { %v2759_v9 = vadd.f32 %v2758_v6, %v2757_v5  ;;  %v2760_v10 = vpop.f32.mrb[6].mxu0  ;;  %v2780_v11 = vpop.f32.mrb[5].mxu1 }
 0x12b   :  { %v2761_v12 = vpop.f32.mrb[7].mxu0  ;;  %v2781_v14 = vadd.f32 %v2780_v11, %v2779_v8  ;;  %v2782_v15 = vpop.f32.mrb[6].mxu1 }
 0x12c   :  { %v1877_v13 = vadd.f32 %v2759_v9, %v1837_v62  ;;  %v2783_v16 = vpop.f32.mrb[7].mxu1  ;;  %v2679_v15 = vld [vmem:[%s3479_s4] ss:$0 sm:$0xff] }
 0x12e   :  { %v1917_v18 = vadd.f32 %v2781_v14, %v1877_v13  ;;  %v3235_v13 = vld [vmem:[%s3480_s5 + $0x30] sm:$0xff]   ;;  %v3236_v14 = vld [vmem:[%s3480_s5 + $0x38] sm:$0xff]   ;;  %s2477_s5 = sshll.u32 %s3291_s29, 4  ;;  %s2478_s5 = int_to_ptr.vmem [resolvable:$true] %s2477_s5 }
 0x12f   :  { %3012 = vmatpush3.bf16.msra.mxu1 %v3235_v13  ;;  %s3259_s4 = scalar_lea.vmem %s2478_s5, 32  ;;  %p3264_p9 = scmp.lt.s32.totalorder %s2478_s5, %s2478_s5 }
 0x130   :  { %3013 = vmatprep.subr.bf16.mxu1 %v3289_v0  ;;  %v2688_v0 = vld [vmem:[%s3481_s6] ss:$0 sm:$0xff]  ;;  %p3260_p8 = scmp.ne.s32.totalorder %s2478_s5, %s3259_s4  ;;  %p3265_p10 = scmp.lt.s32.totalorder %s3259_s4, %s3259_s4 }
 0x132   :  { %p3266_p11 = por %p3265_p10, %p3264_p9 }
 0x133   :  { %3014 = vmatpush3.bf16.msra.mxu1 %v3236_v14 }
 0x134   :  { %p3267_p12 = pnand %p3266_p11, %p3260_p8 }
 0x148   :  { %v2801_v26 = vpop.f32.mrb[8].mxu0 }
 0x149   :  { %v2802_v27 = vpop.f32.mrb[9].mxu0  ;;  %v2823_v28 = vpop.f32.mrb[8].mxu1 }
 0x14a   :  { %v2803_v29 = vadd.f32 %v2802_v27, %v2801_v26  ;;  %v2804_v30 = vpop.f32.mrb[10].mxu0  ;;  %v2824_v31 = vpop.f32.mrb[9].mxu1 }
 0x14b   :  { %v2805_v32 = vpop.f32.mrb[11].mxu0  ;;  %v2825_v34 = vadd.f32 %v2824_v31, %v2823_v28  ;;  %v2826_v36 = vpop.f32.mrb[10].mxu1 }
 0x14c   :  { %v1957_v33 = vadd.f32 %v2803_v29, %v1917_v18  ;;  %v2827_v37 = vpop.f32.mrb[11].mxu1 }
 0x14e   :  { %v1997_v38 = vadd.f32 %v2825_v34, %v1957_v33 }
 0x168   :  { %v2845_v39 = vpop.f32.mrb[12].mxu0 }
 0x169   :  { %v2846_v40 = vpop.f32.mrb[13].mxu0  ;;  %v2867_v41 = vpop.f32.mrb[12].mxu1 }
 0x16a   :  { %v2847_v42 = vadd.f32 %v2846_v40, %v2845_v39  ;;  %v2848_v43 = vpop.f32.mrb[14].mxu0  ;;  %v2868_v44 = vpop.f32.mrb[13].mxu1 }
 0x16b   :  { %v2849_v45 = vpop.f32.mrb[15].mxu0  ;;  %v2869_v47 = vadd.f32 %v2868_v44, %v2867_v41  ;;  %v2870_v48 = vpop.f32.mrb[14].mxu1 }
 0x16c   :  { %v2037_v46 = vadd.f32 %v2847_v42, %v1997_v38  ;;  %v2871_v49 = vpop.f32.mrb[15].mxu1 }
 0x16e   :  { %v2077_v50 = vadd.f32 %v2869_v47, %v2037_v46 }
 0x188   :  { %v2889_v51 = vpop.f32.mrb[16].mxu0 }
 0x189   :  { %v2890_v52 = vpop.f32.mrb[17].mxu0  ;;  %v2911_v53 = vpop.f32.mrb[16].mxu1 }
 0x18a   :  { %v2891_v54 = vadd.f32 %v2890_v52, %v2889_v51  ;;  %v2892_v55 = vpop.f32.mrb[18].mxu0  ;;  %v2912_v56 = vpop.f32.mrb[17].mxu1 }
 0x18b   :  { %v2893_v57 = vpop.f32.mrb[19].mxu0  ;;  %v2913_v59 = vadd.f32 %v2912_v56, %v2911_v53  ;;  %v2914_v35 = vpop.f32.mrb[18].mxu1 }
 0x18c   :  { %v2117_v58 = vadd.f32 %v2891_v54, %v2077_v50  ;;  %v2915_v60 = vpop.f32.mrb[19].mxu1 }
 0x18e   :  { %v2157_v61 = vadd.f32 %v2913_v59, %v2117_v58 }
 0x1a8   :  { %v2933_v62 = vpop.f32.mrb[20].mxu0 }
 0x1a9   :  { %v2934_v63 = vpop.f32.mrb[21].mxu0  ;;  %v2955_v1 = vpop.f32.mrb[20].mxu1 }
 0x1aa   :  { %v2935_v2 = vadd.f32 %v2934_v63, %v2933_v62  ;;  %v2936_v3 = vpop.f32.mrb[22].mxu0  ;;  %v2956_v4 = vpop.f32.mrb[21].mxu1 }
 0x1ab   :  { %v2937_v5 = vpop.f32.mrb[23].mxu0  ;;  %v2957_v7 = vadd.f32 %v2956_v4, %v2955_v1  ;;  %v2958_v8 = vpop.f32.mrb[22].mxu1 }
 0x1ac   :  { %v2197_v6 = vadd.f32 %v2935_v2, %v2157_v61  ;;  %v2959_v9 = vpop.f32.mrb[23].mxu1 }
 0x1ae   :  { %v2237_v10 = vadd.f32 %v2957_v7, %v2197_v6 }
 0x1b0   :  { %v2242_v11 = vmax.f32 %v2237_v10, 0.0 }
 0x1b2   :  { %v2243_v12 = vpack.c.bf16 %v2242_v11, %v2242_v11 }
 0x1b4   :  { %2996 = vmatmul.mubr.bf16.vlgmr.msra.gmra.mrb[24].mxu0 %v2243_v12 }
 0x287   :  { %v2349_v16 = vpop.f32.mrb[24].mxu0 }
 0x288   :  { %v2350_v17 = vadd.f32 %v2679_v15, %v2349_v16  ;;  %v2997_v18 = vpop.f32.mrb[25].mxu0 }
 0x289   :  { %v2352_v19 = vpop.f32.mrb[26].mxu0 }
 0x28a   :  { %v2355_v20 = vmax.f32 %v2350_v17, 0.0  ;;  %v2998_v21 = vpop.f32.mrb[27].mxu0 }
 0x28c   :  { %v2356_v22 = vpack.c.bf16 %v2355_v20, %v2355_v20 }
 0x28e   :  { %3016 = vmatmul.mubr.bf16.vlgmr.msra.gmra.mrb[24].mxu1 %v2356_v22 }
 0x361   :  { %v2462_v23 = vpop.f32.mrb[24].mxu1 }
 0x362   :  { %v2463_v24 = vadd.f32 %v2688_v0, %v2462_v23  ;;  %v3017_v25 = vpop.f32.mrb[25].mxu1 }
 0x363   :  { %v2465_v26 = vpop.f32.mrb[26].mxu1 }
 0x364   :  { %v2468_v27 = vmax.f32 %v2463_v24, 0.0  ;;  %v3018_v28 = vpop.f32.mrb[27].mxu1 }
 0x366   :  { %2470 = vst.msk [vmem:[#allocation5] sm:$0x3] %vm2469_vm1, %v2468_v27 }
 0x367   :  { %3270 = shalt.err (!%p3267_p12)
}
 0x368   :  { %s3271_s8 = scalar_lea.hbm %s3482_s7, 32 }
 0x369   :  { %p3272_p13 = scmp.ne.s32.totalorder %s3482_s7, %s3271_s8  ;;  %p3275_p0 = scmp.lt.u32.totalorder %s3271_s8, %s3482_s7 }
 0x36b   :  { %p3277_p1 = pnand %p3275_p0, %p3272_p13 }
 0x36d   :  { %3280 = shalt.err (!%p3277_p1)
}
 0x36e   :  { %2480 = dma.vmem_to_hbm [thread:$0]  %s2478_s5, 32, %s3482_s7, [#allocation4]  }
 0x36f   :  { %3283 = dma.done.wait [#allocation4], 32  }
 0x370   :  { %3284 = vsyncadd [#allocation4], 4294967264 }
 0x371   :  { %2484 = vsyncpa [#allocation3], 1 }
 0x372   :  { %2485 = vsyncpa [#allocation4], 1 }

</bundles_post_ra>
